<compile_context>
chip_gen: v7x
topology: tpu7x:2x2x1
jax: 0.10.0
libtpu: 0.0.40
codegen_flags: <defaults>
</compile_context>

<pallas_src>
import functools

import jax
import jax.numpy as jnp
from jax.experimental import pallas as pl
from jax.experimental.pallas import tpu as pltpu

# ---- small synthetic model dims (consistent with the PyTorch module) ----
EMBED_DIM   = 16   # embedding_dim
ENC_HIDDEN  = 32   # encoder_hidden_size
ATTN_HIDDEN = 32   # attention_hidden_size (PyTorch code implicitly needs == ENC_HIDDEN)
OUTPUT_SIZE = 20   # output_size (vocab)
NUM_LAYERS  = 2    # decoder LSTM layers
NUM_FILTERS = 8    # conv filters
BATCH       = 2
ENC_T       = 8    # encoder sequence length
K_TAPS      = 3    # Conv1d kernel size


def _pack_rows(sections):
    """Stack (name, (rows, lanes)) sections into one slab, 8-row aligned starts."""
    off, pieces, cur = {}, [], 0
    for name, mat in sections:
        mat = jnp.asarray(mat, jnp.float32)
        off[name] = cur
        pieces.append(mat)
        cur += mat.shape[0]
        pad = (-cur) % 8
        if pad:
            pieces.append(jnp.zeros((pad, mat.shape[1]), jnp.float32))
            cur += pad
    return off, jnp.concatenate(pieces, axis=0)


def _decoder_kernel(off, soff, L, B, T, H, E, V,
                    emb_ref, stat_ref, w_ref, slab_ref, hc_s, attn_s):
    """One decode step per grid iteration.

    emb_ref  : (B, E)      embedded input token for this step (per-step DMA)
    stat_ref : (SR, 4H)    resident static slab: enc@W2^T, enc|attn0, hc0, selectors
    w_ref    : (WR, 4H)    resident packed parameter slab
    slab_ref : (8, 4H)     per-step output tile: [logp ; h/c ; attention]
    hc_s     : (L*B, 4H)   carried [h|c] state          (VMEM scratch)
    attn_s   : (B*T, 1)    carried attention column     (VMEM scratch)
    """
    f32 = jnp.float32
    LANES = 4 * H
    BT = B * T
    step = pl.program_id(0)

    # ---- step 0: load carried state from the static slab ----
    @pl.when(step == 0)
    def _():
        hc_s[...] = stat_ref[soff['hc0']:soff['hc0'] + L * B, :]
        attn_s[...] = stat_ref[soff['enc']:soff['enc'] + BT, H:H + 1]

    # lane-constant rows (read once per step, reused by every layer)
    gmul = w_ref[off['gmult']:off['gmult'] + 1, :]
    gadd = w_ref[off['gadd']:off['gadd'] + 1, :]

    # ---------------- multi-layer LSTM: single tanh EUP pass per layer ----------
    x = emb_ref[...]                                             # (B, E)
    hc_rows = []
    for l in range(L):
        in_dim = E if l == 0 else H
        hc_prev = hc_s[l * B:(l + 1) * B, :]
        h_prev = hc_prev[:, 0:H]
        c_prev = hc_prev[:, H:2 * H]
        wx = w_ref[off[f"lstm{l}_wx"]:off[f"lstm{l}_wx"] + in_dim, :]
        wh = w_ref[off[f"lstm{l}_wh"]:off[f"lstm{l}_wh"] + H, :]
        bb = w_ref[off[f"lstm{l}_b"]:off[f"lstm{l}_b"] + 1, :]
        gates = (jnp.dot(x, wx, preferred_element_type=f32)
                 + jnp.dot(h_prev, wh, preferred_element_type=f32) + bb)   # (B, 4H)
        # i/f/o columns were pre-scaled by 0.5 -> sigmoid = 0.5*tanh + 0.5
        act = gmul * jnp.tanh(gates) + gadd
        i_g = act[:, 0:H]
        f_g = act[:, H:2 * H]
        g_g = act[:, 2 * H:3 * H]
        o_g = act[:, 3 * H:4 * H]
        c_new = f_g * c_prev + i_g * g_g
        h_new = o_g * jnp.tanh(c_new)
        row = jnp.concatenate(
            [h_new, c_new, jnp.zeros((B, LANES - 2 * H), f32)], axis=1)     # (B, 4H)
        hc_s[l * B:(l + 1) * B, :] = row
        hc_rows.append(row)
        x = h_new
    dec = x                                                      # (B, H)

    # ---------------- location-aware hybrid attention (vectorised) --------------
    # dec_panel packs W1^T (lanes 0:A) and the dec-half of the output projection
    # (lanes 2H:2H+V): one matmul on `dec` feeds both attention and output head.
    dd = jnp.dot(dec, w_ref[off['dec_panel']:off['dec_panel'] + H, :],
                 preferred_element_type=f32)                     # (B, 4H)
    dd3 = jnp.broadcast_to(dd[:, None, :], (B, T, LANES))

    a3 = attn_s[...].reshape(B, T, 1)                            # previous attention
    prev3 = jnp.concatenate([jnp.zeros((B, 1, 1), f32), a3[:, 0:T - 1, :]], axis=1)
    next3 = jnp.concatenate([a3[:, 1:T, :], jnp.zeros((B, 1, 1), f32)], axis=1)
    cw = off['cw3']                                              # Conv1d folded into W_3
    conv3 = (prev3 * w_ref[cw:cw + 1, :] + a3 * w_ref[cw + 1:cw + 2, :]
             + next3 * w_ref[cw + 2:cw + 3, :])                  # (B, T, 4H)

    enc_proj3 = stat_ref[soff['proj']:soff['proj'] + BT, :].reshape(B, T, LANES)
    bcomb = w_ref[off['bcomb']:off['bcomb'] + 1, :]
    vatt = w_ref[off['vatt']:off['vatt'] + 1, :]
    hsc = jnp.tanh(enc_proj3 + conv3 + dd3 + bcomb)              # (B, T, 4H)
    sc3 = jnp.sum(hsc * vatt, axis=2, keepdims=True)             # (B, T, 1)

    m = jnp.max(sc3, axis=1, keepdims=True)                      # softmax over T
    e = jnp.exp(sc3 - m)
    attn3 = e / jnp.sum(e, axis=1, keepdims=True)                # exact (feeds back)
    attn_col = attn3.reshape(BT, 1)
    attn_s[...] = attn_col                                       # carry to next step

    # context + lane-dense attention rows via constant 0/1 selector matmuls
    sel = stat_ref[soff['sel']:soff['sel'] + B, 0:BT]            # (B, B*T)
    enc_h = stat_ref[soff['enc']:soff['enc'] + BT, 0:H]          # (B*T, H)
    pmat = stat_ref[soff['p']:soff['p'] + BT, 0:T]               # (B*T, T)
    ctx = jnp.dot(sel, attn_col * enc_h, preferred_element_type=f32)      # (B, H)
    attn_bt = jnp.dot(sel, attn_col * pmat, preferred_element_type=f32)   # (B, T)

    # ---------------- output projection + log_softmax ----------------
    # dec-half of the logits lives at lanes 2H:2H+V of dd; 2H == LANES/2 so a
    # half-width lane roll brings it to lanes 0:V.
    logits = (pltpu.roll(dd, shift=2 * H, axis=1)
              + jnp.dot(ctx, w_ref[off['out_w_ctx']:off['out_w_ctx'] + H, :],
                        preferred_element_type=f32)
              + w_ref[off['out_b']:off['out_b'] + 1, :])         # pad lanes ~ -1e30
    # TODO(synk): nn.Dropout(0.1) is identity in eval mode; stochastic dropout not modeled.
    m2 = jnp.max(logits, axis=1, keepdims=True)
    sh = logits - m2
    lse = jnp.log(jnp.sum(jnp.exp(sh), axis=1, keepdims=True))
    logp = (sh - lse) * w_ref[off['vmask']:off['vmask'] + 1, :]  # zero lanes >= V

    # single aligned (8, 4H) lane-dense store: [logp ; h/c per layer ; attention]
    attn_rows = jnp.concatenate(
        [attn_bt, jnp.zeros((B, LANES - T), f32)], axis=1)
    slab_ref[...] = jnp.concatenate([logp] + hc_rows + [attn_rows], axis=0)


def init_params(seed=0):
    """Deterministic synthetic parameters (uniform(-0.1, 0.1)), packed into one slab."""
    key = jax.random.PRNGKey(seed)
    keys = iter(jax.random.split(key, 32))

    def u(shape):
        return jax.random.uniform(next(keys), shape, jnp.float32, -0.1, 0.1)

    E, H, A, F, V, L = EMBED_DIM, ENC_HIDDEN, ATTN_HIDDEN, NUM_FILTERS, OUTPUT_SIZE, NUM_LAYERS
    LANES = 4 * H
    assert A == H, "PyTorch module implicitly requires attention_hidden == encoder_hidden"
    assert V <= 2 * H and A <= 2 * H and BATCH * ENC_T <= LANES

    raw = {}
    raw['embedding'] = u((V, E))                               # nn.Embedding
    raw['lstm'] = []
    for l in range(L):
        in_dim = E if l == 0 else H
        raw['lstm'].append((u((4 * H, in_dim)), u((4 * H, H)), u((4 * H,)), u((4 * H,))))
    raw['out_w'] = u((V, 2 * H))                               # nn.Linear(2H, V)
    raw['out_b'] = u((V,))
    raw['v'] = u((1, H))                                       # self.v
    raw['b_attn'] = u((H,))                                    # self.b
    raw['W1'] = u((A, H))
    raw['W2'] = u((A, H))
    raw['W3'] = u((A, F))
    raw['conv_w'] = u((F, 1, K_TAPS))                          # Conv1d weight
    raw['conv_b'] = u((F,))

    def padL(x, fill=0.0):
        x = jnp.asarray(x, jnp.float32)
        r, c = x.shape
        if c == LANES:
            return x
        return jnp.concatenate([x, jnp.full((r, LANES - c), fill, jnp.float32)], axis=1)

    # gate pre-scale: sigmoid(z) = 0.5*tanh(z/2) + 0.5 -> scale i/f/o columns by 0.5
    gscale = jnp.full((4 * H,), 0.5, jnp.float32).at[2 * H:3 * H].set(1.0)

    sections = []
    for l in range(L):
        w_ih, w_hh, b_ih, b_hh = raw['lstm'][l]
        sections.append((f"lstm{l}_wx", padL(w_ih.T * gscale[None, :])))
        sections.append((f"lstm{l}_wh", padL(w_hh.T * gscale[None, :])))
        sections.append((f"lstm{l}_b",  padL(((b_ih + b_hh) * gscale)[None, :])))

    # fused dec panel: lanes 0:A = W1^T, lanes 2H:2H+V = out_w[:, H:2H]^T
    dec_panel = jnp.zeros((H, LANES), jnp.float32)
    dec_panel = dec_panel.at[:, 0:A].set(raw['W1'].T)
    dec_panel = dec_panel.at[:, 2 * H:2 * H + V].set(raw['out_w'][:, H:2 * H].T)
    sections.append(("dec_panel", dec_panel))
    sections.append(("out_w_ctx", padL(raw['out_w'][:, 0:H].T)))

    # Conv1d is linear and feeds W_3 directly -> fold them
    cw3 = raw['conv_w'][:, 0, :].T @ raw['W3'].T                           # (3, A)
    bcomb = raw['conv_b'][None, :] @ raw['W3'].T + raw['b_attn'][None, :]  # (1, A)
    sections += [
        ("cw3",   padL(cw3)),
        ("bcomb", padL(bcomb)),
        ("vatt",  padL(raw['v'])),
        ("out_b", padL(raw['out_b'][None, :], fill=-1e30)),   # mask lanes >= V
        ("gmult", jnp.full((1, LANES), 0.5, jnp.float32).at[0, 2 * H:3 * H].set(1.0)),
        ("gadd",  jnp.full((1, LANES), 0.5, jnp.float32).at[0, 2 * H:3 * H].set(0.0)),
        ("vmask", jnp.zeros((1, LANES), jnp.float32).at[0, 0:V].set(1.0)),
    ]

    off, wslab = _pack_rows(sections)
    return {'embedding': raw['embedding'], 'W2': raw['W2'],
            'wslab': wslab, 'off': off, 'raw': raw}


def _build_static_slab(params, h0, c0, encoder_output, attn_weights):
    """Per-call resident slab: projected encoder, raw encoder + attn0, hc0, selectors."""
    L, H, A = NUM_LAYERS, ENC_HIDDEN, ATTN_HIDDEN
    LANES = 4 * H
    T_, B_, _ = encoder_output.shape
    BT = B_ * T_

    enc_rows = jnp.transpose(encoder_output, (1, 0, 2)).reshape(BT, H)     # row b*T+t
    enc_proj = jnp.pad(enc_rows @ params['W2'].T, ((0, 0), (0, LANES - A)))
    attn0_col = attn_weights[:, 0, :].reshape(BT, 1)
    enc_sec = jnp.concatenate(
        [enc_rows, attn0_col, jnp.zeros((BT, LANES - H - 1), jnp.float32)], axis=1)
    hc0 = jnp.pad(jnp.concatenate([h0, c0], axis=-1).reshape(L * B_, 2 * H),
                  ((0, 0), (0, LANES - 2 * H)))
    sel = jnp.pad(jnp.repeat(jnp.eye(B_, dtype=jnp.float32), T_, axis=1),
                  ((0, 0), (0, LANES - BT)))                               # (B, B*T)
    pmat = jnp.pad(jnp.tile(jnp.eye(T_, dtype=jnp.float32), (B_, 1)),
                   ((0, 0), (0, LANES - T_)))                              # (B*T, T)
    return _pack_rows([('proj', enc_proj), ('enc', enc_sec), ('hc0', hc0),
                       ('sel', sel), ('p', pmat)])


def decoder_forward(params, input_tokens, decoder_hidden, encoder_output, attn_weights):
    """Fused decode loop matching iterated PyTorch Decoder.forward semantics.

    input_tokens: (S, B, 1) int32 (teacher-forced) or (B, 1) for a single step.
    decoder_hidden: (h, c) each (L, B, H); encoder_output: (T, B, H);
    attn_weights: (B, 1, T).
    Returns (log_probs, (h, c), attn_weights (…, T, B, 1)), per step for S > 1.
    """
    h0, c0 = decoder_hidden
    single = input_tokens.ndim == 2
    toks = input_tokens[None] if single else input_tokens                  # (S, B, 1)
    S, B_, _ = toks.shape
    T_ = encoder_output.shape[0]
    H, L = ENC_HIDDEN, NUM_LAYERS
    E = params['embedding'].shape[1]
    V = params['embedding'].shape[0]
    LANES = 4 * H
    OUT_ROWS = B_ * (L + 2)

    # glue (layout plumbing / one-time precompute only)
    emb_seq = jnp.take(params['embedding'], toks[:, :, 0], axis=0)         # (S, B, E)
    soff, stat = _build_static_slab(params, h0, c0, encoder_output, attn_weights)

    kernel = functools.partial(_decoder_kernel, params['off'], soff,
                               L, B_, T_, H, E, V)

    grid_spec = pltpu.PrefetchScalarGridSpec(
        num_scalar_prefetch=0,
        grid=(S,),
        in_specs=[
            pl.BlockSpec((None, B_, E), lambda s: (s, 0, 0)),          # per-step token emb
            pl.BlockSpec(stat.shape, lambda s: (0, 0)),                # resident static slab
            pl.BlockSpec(params['wslab'].shape, lambda s: (0, 0)),     # resident weights
        ],
        out_specs=pl.BlockSpec((None, OUT_ROWS, LANES), lambda s: (s, 0, 0)),
        scratch_shapes=[
            pltpu.VMEM((L * B_, LANES), jnp.float32),                  # carried h/c
            pltpu.VMEM((B_ * T_, 1), jnp.float32),                     # carried attention
        ],
    )
    slab = pl.pallas_call(
        kernel,
        out_shape=jax.ShapeDtypeStruct((S, OUT_ROWS, LANES), jnp.float32),
        grid_spec=grid_spec,
        compiler_params=pltpu.CompilerParams(dimension_semantics=("arbitrary",)),
    )(emb_seq, stat, params['wslab'])

    logp = slab[:, 0:B_, 0:V]                                              # (S, B, V)
    hc_last = slab[S - 1, B_:B_ + L * B_, 0:2 * H].reshape(L, B_, 2 * H)
    h_new = hc_last[..., 0:H]
    c_new = hc_last[..., H:2 * H]
    attn = jnp.transpose(slab[:, B_ + L * B_:, 0:T_], (0, 2, 1))[..., None]  # (S, T, B, 1)
    if single:
        return logp[0], (h_new, c_new), attn[0]
    return logp, (h_new, c_new), attn


def _reference_step(raw, tok, h0, c0, encoder_output, attn_weights):
    """Pure-JAX mirror of one PyTorch Decoder.forward call, from raw weights."""
    H, L = ENC_HIDDEN, NUM_LAYERS
    T_ = encoder_output.shape[0]
    x = raw['embedding'][tok[:, 0]]
    hs, cs = [], []
    for l in range(L):
        w_ih, w_hh, b_ih, b_hh = raw['lstm'][l]
        gates = x @ w_ih.T + h0[l] @ w_hh.T + b_ih + b_hh
        i = jax.nn.sigmoid(gates[:, 0:H])
        f = jax.nn.sigmoid(gates[:, H:2 * H])
        g = jnp.tanh(gates[:, 2 * H:3 * H])
        o = jax.nn.sigmoid(gates[:, 3 * H:4 * H])
        c = f * c0[l] + i * g
        h = o * jnp.tanh(c)
        hs.append(h)
        cs.append(c)
        x = h
    dec = x
    aw = attn_weights[:, 0, :]
    awp = jnp.pad(aw, ((0, 0), (1, 1)))
    conv_w = raw['conv_w'][:, 0, :]
    conv_feat = jnp.stack(
        [awp[:, t:t + K_TAPS] @ conv_w.T + raw['conv_b'] for t in range(T_)], axis=0)
    s = jnp.tanh(dec[None] @ raw['W1'].T + encoder_output @ raw['W2'].T
                 + conv_feat @ raw['W3'].T + raw['b_attn'])
    scores = jnp.einsum('tba,a->tb', s, raw['v'][0])[..., None]
    attn = jax.nn.softmax(scores, axis=0)                                  # (T, B, 1)
    ctx = jnp.einsum('tb,tbh->bh', attn[..., 0], encoder_output)
    logits = jnp.concatenate([ctx, dec], axis=1) @ raw['out_w'].T + raw['out_b']
    logp = jax.nn.log_softmax(logits, axis=1)
    return logp, (jnp.stack(hs), jnp.stack(cs)), attn


if __name__ == "__main__":
    params = init_params(seed=0)

    key = jax.random.PRNGKey(0)
    k1, k2, k3, k4, k5 = jax.random.split(key, 5)
    S = 4
    toks = jax.random.randint(k1, (S, BATCH, 1), 0, OUTPUT_SIZE, dtype=jnp.int32)
    h0 = jax.random.normal(k2, (NUM_LAYERS, BATCH, ENC_HIDDEN), jnp.float32)
    c0 = jax.random.normal(k3, (NUM_LAYERS, BATCH, ENC_HIDDEN), jnp.float32)
    enc = jax.random.normal(k4, (ENC_T, BATCH, ENC_HIDDEN), jnp.float32)
    attn0 = jax.nn.softmax(jax.random.normal(k5, (BATCH, 1, ENC_T), jnp.float32), axis=-1)

    # fused multi-step decode (one pallas_call, grid over steps)
    logp_seq, (h_n, c_n), attn_seq = decoder_forward(params, toks, (h0, c0), enc, attn0)
    jax.block_until_ready((logp_seq, h_n, c_n, attn_seq))
    assert logp_seq.shape == (S, BATCH, OUTPUT_SIZE)
    assert h_n.shape == (NUM_LAYERS, BATCH, ENC_HIDDEN)
    assert c_n.shape == (NUM_LAYERS, BATCH, ENC_HIDDEN)
    assert attn_seq.shape == (S, ENC_T, BATCH, 1)

    # single-step call (original forward signature)
    logp1, (h1, c1), attn1 = decoder_forward(params, toks[0], (h0, c0), enc, attn0)
    jax.block_until_ready((logp1, h1, c1, attn1))
    assert logp1.shape == (BATCH, OUTPUT_SIZE)
    assert attn1.shape == (ENC_T, BATCH, 1)

    # numerical check vs. a pure-JAX mirror of the PyTorch math, iterated step by step
    rh, rc, r_aw = h0, c0, attn0
    for s in range(S):
        r_logp, (rh, rc), r_attn = _reference_step(params['raw'], toks[s], rh, rc, enc, r_aw)
        assert float(jnp.max(jnp.abs(logp_seq[s] - r_logp))) < 2e-2
        assert float(jnp.max(jnp.abs(attn_seq[s] - r_attn))) < 5e-3
        r_aw = jnp.transpose(r_attn, (1, 2, 0))          # feed back as (B, 1, T)
    assert float(jnp.max(jnp.abs(h_n - rh))) < 5e-3
    assert float(jnp.max(jnp.abs(c_n - rc))) < 5e-3
    assert float(jnp.max(jnp.abs(logp1 - logp_seq[0]))) < 1e-5

    print("KERNEL_OK")
</pallas_src>

<mosaic_0001>
module attributes {stable_mosaic.version = 11 : i64} {
  func.func @_decoder_kernel(%arg0: i32, %arg1: memref<1x2x16xf32, #tpu.memory_space<vmem>>, %arg2: memref<64x128xf32, #tpu.memory_space<vmem>>, %arg3: memref<248x128xf32, #tpu.memory_space<vmem>>, %arg4: memref<1x8x128xf32, #tpu.memory_space<vmem>>, %arg5: memref<4x128xf32, #tpu.memory_space<vmem>>, %arg6: memref<16x1xf32, #tpu.memory_space<vmem>>) attributes {dimension_semantics = [#tpu.dimension_semantics<arbitrary>], iteration_bounds = array<i64: 4>, scalar_prefetch = 0 : i64, scratch_operands = 2 : i64, tpu.core_type = #tpu.core_type<tc>, window_params = [{transform_indices = @transform_0, window_bounds = array<i64: 1, 2, 16>}, {pipeline_mode = #tpu.pipeline_mode<synchronous>, transform_indices = @transform_1, window_bounds = array<i64: 64, 128>}, {pipeline_mode = #tpu.pipeline_mode<synchronous>, transform_indices = @transform_2, window_bounds = array<i64: 248, 128>}, {transform_indices = @transform_3, window_bounds = array<i64: 1, 8, 128>}]} {
    %c0_i32 = arith.constant 0 : i32
    %0 = arith.cmpi eq, %arg0, %c0_i32 : i32
    %1 = arith.extui %0 : i1 to i32
    %c0_i32_0 = arith.constant 0 : i32
    %2 = arith.cmpi ne, %1, %c0_i32_0 : i32
    scf.if %2 {
      %c32 = arith.constant 32 : index
      %c0_59 = arith.constant 0 : index
      %154 = vector.load %arg2[%c32, %c0_59] : memref<64x128xf32, #tpu.memory_space<vmem>>, vector<4x128xf32>
      %c0_60 = arith.constant 0 : index
      %c0_61 = arith.constant 0 : index
      %155 = vector.load %arg5[%c0_60, %c0_61] : memref<4x128xf32, #tpu.memory_space<vmem>>, vector<4x128xf32>
      tpu.vector_store %arg5[%c0_60, %c0_61], %154 {strides = array<i32>} : memref<4x128xf32, #tpu.memory_space<vmem>>, vector<4x128xf32>,
      %c16_62 = arith.constant 16 : index
      %c32_63 = arith.constant 32 : index
      %156 = vector.load %arg2[%c16_62, %c32_63] : memref<64x128xf32, #tpu.memory_space<vmem>>, vector<16x1xf32>
      %c0_64 = arith.constant 0 : index
      %c0_65 = arith.constant 0 : index
      %157 = vector.load %arg6[%c0_64, %c0_65] : memref<16x1xf32, #tpu.memory_space<vmem>>, vector<16x1xf32>
      tpu.vector_store %arg6[%c0_64, %c0_65], %156 {strides = array<i32>} : memref<16x1xf32, #tpu.memory_space<vmem>>, vector<16x1xf32>,
    } else {
    }
    %c224 = arith.constant 224 : index
    %c0 = arith.constant 0 : index
    %3 = vector.load %arg3[%c224, %c0] : memref<248x128xf32, #tpu.memory_space<vmem>>, vector<1x128xf32>
    %c232 = arith.constant 232 : index
    %c0_1 = arith.constant 0 : index
    %4 = vector.load %arg3[%c232, %c0_1] : memref<248x128xf32, #tpu.memory_space<vmem>>, vector<1x128xf32>
    %c0_2 = arith.constant 0 : index
    %c0_3 = arith.constant 0 : index
    %c0_4 = arith.constant 0 : index
    %5 = vector.load %arg1[%c0_2, %c0_3, %c0_4] : memref<1x2x16xf32, #tpu.memory_space<vmem>>, vector<1x2x16xf32>
    %6 = vector.shape_cast %5 : vector<1x2x16xf32> to vector<2x16xf32>
    %c0_5 = arith.constant 0 : index
    %c0_6 = arith.constant 0 : index
    %7 = vector.load %arg5[%c0_5, %c0_6] : memref<4x128xf32, #tpu.memory_space<vmem>>, vector<2x128xf32>
    %8 = vector.extract_strided_slice %7 {offsets = [0, 0], sizes = [2, 32], strides = [1, 1]} : vector<2x128xf32> to vector<2x32xf32>
    %9 = vector.extract_strided_slice %7 {offsets = [0, 32], sizes = [2, 32], strides = [1, 1]} : vector<2x128xf32> to vector<2x32xf32>
    %c0_7 = arith.constant 0 : index
    %c0_8 = arith.constant 0 : index
    %10 = vector.load %arg3[%c0_7, %c0_8] : memref<248x128xf32, #tpu.memory_space<vmem>>, vector<16x128xf32>
    %c16 = arith.constant 16 : index
    %c0_9 = arith.constant 0 : index
    %11 = vector.load %arg3[%c16, %c0_9] : memref<248x128xf32, #tpu.memory_space<vmem>>, vector<32x128xf32>
    %c48 = arith.constant 48 : index
    %c0_10 = arith.constant 0 : index
    %12 = vector.load %arg3[%c48, %c0_10] : memref<248x128xf32, #tpu.memory_space<vmem>>, vector<1x128xf32>
    %cst = arith.constant dense<0.000000e+00> : vector<2x128xf32>
    %13 = tpu.matmul %6, %10, %cst {dimension_numbers = #tpu.dot_dimension_numbers<[1], [0], [0], [1], [0, 0, 1, 1], [], []>} : vector<2x16xf32>, vector<16x128xf32>, vector<2x128xf32> -> vector<2x128xf32>
    %cst_11 = arith.constant dense<0.000000e+00> : vector<2x128xf32>
    %14 = tpu.matmul %8, %11, %cst_11 {dimension_numbers = #tpu.dot_dimension_numbers<[1], [0], [0], [1], [0, 0, 1, 1], [], []>} : vector<2x32xf32>, vector<32x128xf32>, vector<2x128xf32> -> vector<2x128xf32>
    %15 = arith.addf %13, %14 : vector<2x128xf32>
    %16 = vector.broadcast %12 : vector<1x128xf32> to vector<2x128xf32>
    %17 = arith.addf %15, %16 : vector<2x128xf32>
    %18 = math.tanh %17 : vector<2x128xf32>
    %19 = vector.broadcast %3 : vector<1x128xf32> to vector<2x128xf32>
    %20 = arith.mulf %19, %18 : vector<2x128xf32>
    %21 = vector.broadcast %4 : vector<1x128xf32> to vector<2x128xf32>
    %22 = arith.addf %20, %21 : vector<2x128xf32>
    %23 = vector.extract_strided_slice %22 {offsets = [0, 0], sizes = [2, 32], strides = [1, 1]} : vector<2x128xf32> to vector<2x32xf32>
    %24 = vector.extract_strided_slice %22 {offsets = [0, 32], sizes = [2, 32], strides = [1, 1]} : vector<2x128xf32> to vector<2x32xf32>
    %25 = vector.extract_strided_slice %22 {offsets = [0, 64], sizes = [2, 32], strides = [1, 1]} : vector<2x128xf32> to vector<2x32xf32>
    %26 = vector.extract_strided_slice %22 {offsets = [0, 96], sizes = [2, 32], strides = [1, 1]} : vector<2x128xf32> to vector<2x32xf32>
    %27 = arith.mulf %24, %9 : vector<2x32xf32>
    %28 = arith.mulf %23, %25 : vector<2x32xf32>
    %29 = arith.addf %27, %28 : vector<2x32xf32>
    %30 = math.tanh %29 : vector<2x32xf32>
    %31 = arith.mulf %26, %30 : vector<2x32xf32>
    %cst_12 = arith.constant 0.000000e+00 : f32
    %32 = vector.broadcast %cst_12 : f32 to vector<2x64xf32>
    %33 = tpu.concatenate %31, %29, %32 in 1 : vector<2x32xf32>, vector<2x32xf32>, vector<2x64xf32> -> vector<2x128xf32>
    %c0_13 = arith.constant 0 : index
    %c0_14 = arith.constant 0 : index
    %34 = vector.load %arg5[%c0_13, %c0_14] : memref<4x128xf32, #tpu.memory_space<vmem>>, vector<2x128xf32>
    tpu.vector_store %arg5[%c0_13, %c0_14], %33 {strides = array<i32>} : memref<4x128xf32, #tpu.memory_space<vmem>>, vector<2x128xf32>,
    %c2 = arith.constant 2 : index
    %c0_15 = arith.constant 0 : index
    %35 = vector.load %arg5[%c2, %c0_15] : memref<4x128xf32, #tpu.memory_space<vmem>>, vector<2x128xf32>
    %36 = vector.extract_strided_slice %35 {offsets = [0, 0], sizes = [2, 32], strides = [1, 1]} : vector<2x128xf32> to vector<2x32xf32>
    %37 = vector.extract_strided_slice %35 {offsets = [0, 32], sizes = [2, 32], strides = [1, 1]} : vector<2x128xf32> to vector<2x32xf32>
    %c56 = arith.constant 56 : index
    %c0_16 = arith.constant 0 : index
    %38 = vector.load %arg3[%c56, %c0_16] : memref<248x128xf32, #tpu.memory_space<vmem>>, vector<32x128xf32>
    %c88 = arith.constant 88 : index
    %c0_17 = arith.constant 0 : index
    %39 = vector.load %arg3[%c88, %c0_17] : memref<248x128xf32, #tpu.memory_space<vmem>>, vector<32x128xf32>
    %c120 = arith.constant 120 : index
    %c0_18 = arith.constant 0 : index
    %40 = vector.load %arg3[%c120, %c0_18] : memref<248x128xf32, #tpu.memory_space<vmem>>, vector<1x128xf32>
    %cst_19 = arith.constant dense<0.000000e+00> : vector<2x128xf32>
    %41 = tpu.matmul %31, %38, %cst_19 {dimension_numbers = #tpu.dot_dimension_numbers<[1], [0], [0], [1], [0, 0, 1, 1], [], []>} : vector<2x32xf32>, vector<32x128xf32>, vector<2x128xf32> -> vector<2x128xf32>
    %cst_20 = arith.constant dense<0.000000e+00> : vector<2x128xf32>
    %42 = tpu.matmul %36, %39, %cst_20 {dimension_numbers = #tpu.dot_dimension_numbers<[1], [0], [0], [1], [0, 0, 1, 1], [], []>} : vector<2x32xf32>, vector<32x128xf32>, vector<2x128xf32> -> vector<2x128xf32>
    %43 = arith.addf %41, %42 : vector<2x128xf32>
    %44 = vector.broadcast %40 : vector<1x128xf32> to vector<2x128xf32>
    %45 = arith.addf %43, %44 : vector<2x128xf32>
    %46 = math.tanh %45 : vector<2x128xf32>
    %47 = vector.broadcast %3 : vector<1x128xf32> to vector<2x128xf32>
    %48 = arith.mulf %47, %46 : vector<2x128xf32>
    %49 = vector.broadcast %4 : vector<1x128xf32> to vector<2x128xf32>
    %50 = arith.addf %48, %49 : vector<2x128xf32>
    %51 = vector.extract_strided_slice %50 {offsets = [0, 0], sizes = [2, 32], strides = [1, 1]} : vector<2x128xf32> to vector<2x32xf32>
    %52 = vector.extract_strided_slice %50 {offsets = [0, 32], sizes = [2, 32], strides = [1, 1]} : vector<2x128xf32> to vector<2x32xf32>
    %53 = vector.extract_strided_slice %50 {offsets = [0, 64], sizes = [2, 32], strides = [1, 1]} : vector<2x128xf32> to vector<2x32xf32>
    %54 = vector.extract_strided_slice %50 {offsets = [0, 96], sizes = [2, 32], strides = [1, 1]} : vector<2x128xf32> to vector<2x32xf32>
    %55 = arith.mulf %52, %37 : vector<2x32xf32>
    %56 = arith.mulf %51, %53 : vector<2x32xf32>
    %57 = arith.addf %55, %56 : vector<2x32xf32>
    %58 = math.tanh %57 : vector<2x32xf32>
    %59 = arith.mulf %54, %58 : vector<2x32xf32>
    %cst_21 = arith.constant 0.000000e+00 : f32
    %60 = vector.broadcast %cst_21 : f32 to vector<2x64xf32>
    %61 = tpu.concatenate %59, %57, %60 in 1 : vector<2x32xf32>, vector<2x32xf32>, vector<2x64xf32> -> vector<2x128xf32>
    %c2_22 = arith.constant 2 : index
    %c0_23 = arith.constant 0 : index
    %62 = vector.load %arg5[%c2_22, %c0_23] : memref<4x128xf32, #tpu.memory_space<vmem>>, vector<2x128xf32>
    tpu.vector_store %arg5[%c2_22, %c0_23], %61 {strides = array<i32>} : memref<4x128xf32, #tpu.memory_space<vmem>>, vector<2x128xf32>,
    %c128 = arith.constant 128 : index
    %c0_24 = arith.constant 0 : index
    %63 = vector.load %arg3[%c128, %c0_24] : memref<248x128xf32, #tpu.memory_space<vmem>>, vector<32x128xf32>
    %cst_25 = arith.constant dense<0.000000e+00> : vector<2x128xf32>
    %64 = tpu.matmul %59, %63, %cst_25 {dimension_numbers = #tpu.dot_dimension_numbers<[1], [0], [0], [1], [0, 0, 1, 1], [], []>} : vector<2x32xf32>, vector<32x128xf32>, vector<2x128xf32> -> vector<2x128xf32>
    %65 = vector.shape_cast %64 : vector<2x128xf32> to vector<2x1x128xf32>
    %66 = vector.shape_cast %65 : vector<2x1x128xf32> to vector<2x1x128xf32>
    %67 = vector.broadcast %66 : vector<2x1x128xf32> to vector<2x8x128xf32>
    %c0_26 = arith.constant 0 : index
    %c0_27 = arith.constant 0 : index
    %68 = vector.load %arg6[%c0_26, %c0_27] : memref<16x1xf32, #tpu.memory_space<vmem>>, vector<16x1xf32>
    %69 = vector.shape_cast %68 : vector<16x1xf32> to vector<2x8x1xf32>
    %cst_28 = arith.constant 0.000000e+00 : f32
    %70 = vector.broadcast %cst_28 : f32 to vector<2x1x1xf32>
    %71 = vector.extract_strided_slice %69 {offsets = [0, 0, 0], sizes = [2, 7, 1], strides = [1, 1, 1]} : vector<2x8x1xf32> to vector<2x7x1xf32>
    %72 = tpu.concatenate %70, %71 in 1 : vector<2x1x1xf32>, vector<2x7x1xf32> -> vector<2x8x1xf32>
    %73 = vector.extract_strided_slice %69 {offsets = [0, 1, 0], sizes = [2, 7, 1], strides = [1, 1, 1]} : vector<2x8x1xf32> to vector<2x7x1xf32>
    %cst_29 = arith.constant 0.000000e+00 : f32
    %74 = vector.broadcast %cst_29 : f32 to vector<2x1x1xf32>
    %75 = tpu.concatenate %73, %74 in 1 : vector<2x7x1xf32>, vector<2x1x1xf32> -> vector<2x8x1xf32>
    %c192 = arith.constant 192 : index
    %c0_30 = arith.constant 0 : index
    %76 = vector.load %arg3[%c192, %c0_30] : memref<248x128xf32, #tpu.memory_space<vmem>>, vector<1x128xf32>
    %77 = vector.shape_cast %76 : vector<1x128xf32> to vector<1x1x128xf32>
    %78 = vector.broadcast %72 : vector<2x8x1xf32> to vector<2x8x128xf32>
    %79 = vector.broadcast %77 : vector<1x1x128xf32> to vector<2x8x128xf32>
    %80 = arith.mulf %78, %79 : vector<2x8x128xf32>
    %c193 = arith.constant 193 : index
    %c0_31 = arith.constant 0 : index
    %81 = vector.load %arg3[%c193, %c0_31] : memref<248x128xf32, #tpu.memory_space<vmem>>, vector<1x128xf32>
    %82 = vector.shape_cast %81 : vector<1x128xf32> to vector<1x1x128xf32>
    %83 = vector.broadcast %69 : vector<2x8x1xf32> to vector<2x8x128xf32>
    %84 = vector.broadcast %82 : vector<1x1x128xf32> to vector<2x8x128xf32>
    %85 = arith.mulf %83, %84 : vector<2x8x128xf32>
    %86 = arith.addf %80, %85 : vector<2x8x128xf32>
    %c194 = arith.constant 194 : index
    %c0_32 = arith.constant 0 : index
    %87 = vector.load %arg3[%c194, %c0_32] : memref<248x128xf32, #tpu.memory_space<vmem>>, vector<1x128xf32>
    %88 = vector.shape_cast %87 : vector<1x128xf32> to vector<1x1x128xf32>
    %89 = vector.broadcast %75 : vector<2x8x1xf32> to vector<2x8x128xf32>
    %90 = vector.broadcast %88 : vector<1x1x128xf32> to vector<2x8x128xf32>
    %91 = arith.mulf %89, %90 : vector<2x8x128xf32>
    %92 = arith.addf %86, %91 : vector<2x8x128xf32>
    %c0_33 = arith.constant 0 : index
    %c0_34 = arith.constant 0 : index
    %93 = vector.load %arg2[%c0_33, %c0_34] : memref<64x128xf32, #tpu.memory_space<vmem>>, vector<16x128xf32>
    %94 = vector.shape_cast %93 : vector<16x128xf32> to vector<2x8x128xf32>
    %c200 = arith.constant 200 : index
    %c0_35 = arith.constant 0 : index
    %95 = vector.load %arg3[%c200, %c0_35] : memref<248x128xf32, #tpu.memory_space<vmem>>, vector<1x128xf32>
    %c208 = arith.constant 208 : index
    %c0_36 = arith.constant 0 : index
    %96 = vector.load %arg3[%c208, %c0_36] : memref<248x128xf32, #tpu.memory_space<vmem>>, vector<1x128xf32>
    %97 = arith.addf %94, %92 : vector<2x8x128xf32>
    %98 = arith.addf %97, %67 : vector<2x8x128xf32>
    %99 = vector.shape_cast %95 : vector<1x128xf32> to vector<1x1x128xf32>
    %100 = vector.broadcast %99 : vector<1x1x128xf32> to vector<2x8x128xf32>
    %101 = arith.addf %98, %100 : vector<2x8x128xf32>
    %102 = math.tanh %101 : vector<2x8x128xf32>
    %103 = vector.shape_cast %96 : vector<1x128xf32> to vector<1x1x128xf32>
    %104 = vector.broadcast %103 : vector<1x1x128xf32> to vector<2x8x128xf32>
    %105 = arith.mulf %102, %104 : vector<2x8x128xf32>
    %cst_37 = arith.constant dense<0.000000e+00> : vector<2x8xf32>
    %106 = vector.multi_reduction <add>, %105, %cst_37 [2] : vector<2x8x128xf32> to vector<2x8xf32>
    %107 = vector.shape_cast %106 : vector<2x8xf32> to vector<2x8x1xf32>
    %cst_38 = arith.constant dense<0xFF800000> : vector<2x1xf32>
    %108 = vector.multi_reduction <maximumf>, %107, %cst_38 [1] : vector<2x8x1xf32> to vector<2x1xf32>
    %109 = vector.shape_cast %108 : vector<2x1xf32> to vector<2x1x1xf32>
    %110 = vector.broadcast %109 : vector<2x1x1xf32> to vector<2x8x1xf32>
    %111 = arith.subf %107, %110 : vector<2x8x1xf32>
    %112 = math.exp %111 : vector<2x8x1xf32>
    %cst_39 = arith.constant dense<0.000000e+00> : vector<2x1xf32>
    %113 = vector.multi_reduction <add>, %112, %cst_39 [1] : vector<2x8x1xf32> to vector<2x1xf32>
    %114 = vector.shape_cast %113 : vector<2x1xf32> to vector<2x1x1xf32>
    %115 = vector.broadcast %114 : vector<2x1x1xf32> to vector<2x8x1xf32>
    %116 = arith.divf %112, %115 : vector<2x8x1xf32>
    %117 = vector.shape_cast %116 : vector<2x8x1xf32> to vector<16x1xf32>
    %c0_40 = arith.constant 0 : index
    %c0_41 = arith.constant 0 : index
    %118 = vector.load %arg6[%c0_40, %c0_41] : memref<16x1xf32, #tpu.memory_space<vmem>>, vector<16x1xf32>
    tpu.vector_store %arg6[%c0_40, %c0_41], %117 {strides = array<i32>} : memref<16x1xf32, #tpu.memory_space<vmem>>, vector<16x1xf32>,
    %c40 = arith.constant 40 : index
    %c0_42 = arith.constant 0 : index
    %119 = vector.load %arg2[%c40, %c0_42] : memref<64x128xf32, #tpu.memory_space<vmem>>, vector<2x16xf32>
    %c16_43 = arith.constant 16 : index
    %c0_44 = arith.constant 0 : index
    %120 = vector.load %arg2[%c16_43, %c0_44] : memref<64x128xf32, #tpu.memory_space<vmem>>, vector<16x32xf32>
    %c48_45 = arith.constant 48 : index
    %c0_46 = arith.constant 0 : index
    %121 = vector.load %arg2[%c48_45, %c0_46] : memref<64x128xf32, #tpu.memory_space<vmem>>, vector<16x8xf32>
    %122 = vector.broadcast %117 : vector<16x1xf32> to vector<16x32xf32>
    %123 = arith.mulf %122, %120 : vector<16x32xf32>
    %cst_47 = arith.constant dense<0.000000e+00> : vector<2x32xf32>
    %124 = tpu.matmul %119, %123, %cst_47 {dimension_numbers = #tpu.dot_dimension_numbers<[1], [0], [0], [1], [0, 0, 1, 1], [], []>} : vector<2x16xf32>, vector<16x32xf32>, vector<2x32xf32> -> vector<2x32xf32>
    %125 = vector.broadcast %117 : vector<16x1xf32> to vector<16x8xf32>
    %126 = arith.mulf %125, %121 : vector<16x8xf32>
    %cst_48 = arith.constant dense<0.000000e+00> : vector<2x8xf32>
    %127 = tpu.matmul %119, %126, %cst_48 {dimension_numbers = #tpu.dot_dimension_numbers<[1], [0], [0], [1], [0, 0, 1, 1], [], []>} : vector<2x16xf32>, vector<16x8xf32>, vector<2x8xf32> -> vector<2x8xf32>
    %c64_i32 = arith.constant 64 : i32
    %128 = tpu.dynamic_rotate %64 by %c64_i32 dim 1 : vector<2x128xf32>, i32 -> vector<2x128xf32>
    %c160 = arith.constant 160 : index
    %c0_49 = arith.constant 0 : index
    %129 = vector.load %arg3[%c160, %c0_49] : memref<248x128xf32, #tpu.memory_space<vmem>>, vector<32x128xf32>
    %cst_50 = arith.constant dense<0.000000e+00> : vector<2x128xf32>
    %130 = tpu.matmul %124, %129, %cst_50 {dimension_numbers = #tpu.dot_dimension_numbers<[1], [0], [0], [1], [0, 0, 1, 1], [], []>} : vector<2x32xf32>, vector<32x128xf32>, vector<2x128xf32> -> vector<2x128xf32>
    %131 = arith.addf %128, %130 : vector<2x128xf32>
    %c216 = arith.constant 216 : index
    %c0_51 = arith.constant 0 : index
    %132 = vector.load %arg3[%c216, %c0_51] : memref<248x128xf32, #tpu.memory_space<vmem>>, vector<1x128xf32>
    %133 = vector.broadcast %132 : vector<1x128xf32> to vector<2x128xf32>
    %134 = arith.addf %131, %133 : vector<2x128xf32>
    %cst_52 = arith.constant dense<0xFF800000> : vector<2xf32>
    %135 = vector.multi_reduction <maximumf>, %134, %cst_52 [1] : vector<2x128xf32> to vector<2xf32>
    %136 = vector.shape_cast %135 : vector<2xf32> to vector<2x1xf32>
    %137 = vector.broadcast %136 : vector<2x1xf32> to vector<2x128xf32>
    %138 = arith.subf %134, %137 : vector<2x128xf32>
    %139 = math.exp %138 : vector<2x128xf32>
    %cst_53 = arith.constant dense<0.000000e+00> : vector<2xf32>
    %140 = vector.multi_reduction <add>, %139, %cst_53 [1] : vector<2x128xf32> to vector<2xf32>
    %141 = vector.shape_cast %140 : vector<2xf32> to vector<2x1xf32>
    %142 = math.log %141 : vector<2x1xf32>
    %143 = vector.broadcast %142 : vector<2x1xf32> to vector<2x128xf32>
    %144 = arith.subf %138, %143 : vector<2x128xf32>
    %c240 = arith.constant 240 : index
    %c0_54 = arith.constant 0 : index
    %145 = vector.load %arg3[%c240, %c0_54] : memref<248x128xf32, #tpu.memory_space<vmem>>, vector<1x128xf32>
    %146 = vector.broadcast %145 : vector<1x128xf32> to vector<2x128xf32>
    %147 = arith.mulf %144, %146 : vector<2x128xf32>
    %cst_55 = arith.constant 0.000000e+00 : f32
    %148 = vector.broadcast %cst_55 : f32 to vector<2x120xf32>
    %149 = tpu.concatenate %127, %148 in 1 : vector<2x8xf32>, vector<2x120xf32> -> vector<2x128xf32>
    %150 = tpu.concatenate %147, %33, %61, %149 in 0 : vector<2x128xf32>, vector<2x128xf32>, vector<2x128xf32>, vector<2x128xf32> -> vector<8x128xf32>
    %c0_56 = arith.constant 0 : index
    %c0_57 = arith.constant 0 : index
    %c0_58 = arith.constant 0 : index
    %151 = vector.load %arg4[%c0_56, %c0_57, %c0_58] : memref<1x8x128xf32, #tpu.memory_space<vmem>>, vector<1x8x128xf32>
    %152 = vector.shape_cast %151 : vector<1x8x128xf32> to vector<8x128xf32>
    %153 = vector.shape_cast %150 : vector<8x128xf32> to vector<1x8x128xf32>
    tpu.vector_store %arg4[%c0_56, %c0_57, %c0_58], %153 {strides = array<i32>} : memref<1x8x128xf32, #tpu.memory_space<vmem>>, vector<1x8x128xf32>,
    return
  }
  func.func @transform_0(%arg0: i32) -> (i32, i32, i32) {
    %c0_i32 = arith.constant 0 : i32
    %c0_i32_0 = arith.constant 0 : i32
    %c0_i32_1 = arith.constant 0 : i32
    return %arg0, %c0_i32, %c0_i32_0 : i32, i32, i32
  }
  func.func @transform_1(%arg0: i32) -> (i32, i32) {
    %c0_i32 = arith.constant 0 : i32
    %c0_i32_0 = arith.constant 0 : i32
    %c0_i32_1 = arith.constant 0 : i32
    return %c0_i32, %c0_i32_0 : i32, i32
  }
  func.func @transform_2(%arg0: i32) -> (i32, i32) {
    %c0_i32 = arith.constant 0 : i32
    %c0_i32_0 = arith.constant 0 : i32
    %c0_i32_1 = arith.constant 0 : i32
    return %c0_i32, %c0_i32_0 : i32, i32
  }
  func.func @transform_3(%arg0: i32) -> (i32, i32, i32) {
    %c0_i32 = arith.constant 0 : i32
    %c0_i32_0 = arith.constant 0 : i32
    %c0_i32_1 = arith.constant 0 : i32
    return %arg0, %c0_i32, %c0_i32_0 : i32, i32, i32
  }
}

</mosaic_0001>

<bundles_post_ra>
// kernel: tpu_custom_call.1
= control target key start
LH: loop header
LB: loop body
LE: loop exit
PB: predicated region body
PF: predicated region fallthrough
CT: control target
= control target key end

     0   :  { %8 = vsyncpa [#allocation5], 0  ;;  %s2015_s0 = inlined_call_operand.hbm [shape: f32[4,2,16], index: 0, kind: input, shape index: {}]   ;;  %s2016_s1 = inlined_call_operand.hbm [shape: f32[64,128], index: 1, kind: input, shape index: {}]   ;;  %s2017_s2 = inlined_call_operand.hbm [shape: f32[248,128], index: 2, kind: input, shape index: {}]   ;;  %s2018_s3 = inlined_call_operand.hbm [shape: f32[4,8,128], index: 3, kind: output, shape index: {}]  }
   0x1   :  { %10 = vsyncpa [#allocation5 + $0x1], 0 }
   0x2   :  { %11 = vsyncpa [#allocation8], 0 }
   0x3   :  { %12 = vsyncpa [#allocation6], 0 }
   0x4   :  { %14 = vsyncpa [#allocation6 + $0x1], 0  ;;  %s1721_s12 = smov 0   ;;  %s1723_s13 = smov 0  }
   0x5   :  { %s1725_s14 = smov 0   ;;  %s1727_s15 = smov 0  }
   0x6 LB: > { %s1742_s16 = sadd.s32 4294967295, %s1685_s15   ;;  %s1241_s17 = sadd.s32 4294967294, %s1685_s15   ;;  %s1685_s15 = sphi %s1727_s15, %s2038_s15   ;;  %s1681_s14 = sphi %s1725_s14, %s2037_s14   ;;  %s1677_s13 = sphi %s1723_s13, %s2036_s13   ;;  %s1673_s12 = sphi %s1721_s12, %s2035_s12  }
   0x7   : > { %p40_p0 = scmp.ne.s32.totalorder %s1677_s13, %s1673_s12  ;;  %p2019_p1 = scmp.eq.s32.totalorder %s1742_s16, 0 }
   0x8   : > { %p112_p3 = scmp.eq.s32.totalorder %s1241_s17, 3  ;;  %p1242_p5 = scmp.ge.s32.totalorder %s1685_s15, 1 }
   0x9   : > { %p1751_p4 = por %p2019_p1, %p40_p0  ;;  %p119_p7 = scmp.lt.s32.totalorder %s1685_s15, 5 }
   0xa   : > { %p1756_p6 = por %p112_p3, %p40_p0  ;;  %s1687_s21 = smov [#allocation7]  }
   0xb   : > { %s2022_s18 = scalar_select %p1751_p4, 1, 0 }
   0xc   : > { %s2023_s19 = scalar_select %p1756_p6, 1, 0 }
   0xd   : > { %p1762_p9 = pnand %p1242_p5, %p119_p7  ;;  %s131_s22 = sshll.u32 %s1687_s21, 4  ;;  %s132_s22 = int_to_ptr.vmem [resolvable:$true] %s131_s22 }
   0xe   : > { %s1688_s24 = smov [#allocation9]   ;;  %s1529_s28 = scalar_lea.hbm %s2016_s1, 1024 }
   0xf   : > { %s2024_s20 = scalar_select %p1762_p9, 1, 0 }
  0x10   : > { %p1438_p10 = pneg %p1762_p9  ;;  %s144_s25 = sshll.u32 %s1688_s24, 4  ;;  %s1774_s25 = int_to_ptr.vmem [resolvable:$true] %s144_s25 }
  0x11   : > { %p1530_p12 = scmp.ne.s32.totalorder %s2016_s1, %s1529_s28  ;;  %p1536_p5 = scmp.lt.u32.totalorder %s1529_s28, %s2016_s1 }
  0x12   : > { %p1770_p11 = pnand %p1438_p10, %p2019_p1 }
  0x14   : > { %p1531_p13 = pneg %p1770_p11 }
  0x16   : > { %p1532_p0 = pnand %p1531_p13, %p1530_p12 }
  0x18   : > { %p1533_p3 = pneg %p1532_p0 }
  0x1a   : > { %p1538_p7 = pnand %p1536_p5, %p1533_p3 }
  0x1c   : > { %1541 = shalt.err (!%p1538_p7)
}
  0x1d   : > { %s1542_s6 = scalar_lea.vmem %s132_s22, 1024  ;;  %p1550_p2 = scmp.lt.s32.totalorder %s132_s22, %s132_s22 }
  0x1e   : > { %p1543_p10 = scmp.ne.s32.totalorder %s132_s22, %s1542_s6  ;;  %p1551_p6 = scmp.lt.s32.totalorder %s1542_s6, %s1542_s6 }
  0x20   : > { %p1545_p8 = pnand %p1543_p10, %p1531_p13  ;;  %p1552_p4 = por %p1551_p6, %p1550_p2 }
  0x22   : > { %p1546_p1 = pneg %p1545_p8 }
  0x24   : > { %p1553_p9 = pnand %p1552_p4, %p1546_p1 }
  0x26   : > { %1556 = shalt.err (!%p1553_p9)
}
  0x27   : > { %s1689_s7 = smov 128   ;;  %s1690_s8 = smov 8  }
  0x28   : > { %1441 = dma.hbm_to_vmem [thread:$0]  (!%p1770_p11), %s2016_s1, 1024, %s132_s22, [#allocation8], %s1689_s7, %s1689_s7, %s1690_s8  }
  0x29   : > { %s1557_s21 = scalar_lea.hbm %s2017_s2, 3968 }
  0x2a   : > { %p1558_p8 = scmp.ne.s32.totalorder %s2017_s2, %s1557_s21  ;;  %p1564_p4 = scmp.lt.u32.totalorder %s1557_s21, %s2017_s2 }
  0x2c   : > { %p1560_p1 = pnand %p1558_p8, %p1531_p13 }
  0x2e   : > { %p1561_p2 = pneg %p1560_p1 }
  0x30   : > { %p1566_p6 = pnand %p1564_p4, %p1561_p2 }
  0x32   : > { %1569 = shalt.err (!%p1566_p6)
}
  0x33   : > { %s1570_s22 = scalar_lea.vmem %s1774_s25, 3968  ;;  %p1578_p3 = scmp.lt.s32.totalorder %s1774_s25, %s1774_s25 }
  0x34   : > { %p1571_p9 = scmp.ne.s32.totalorder %s1774_s25, %s1570_s22  ;;  %p1579_p5 = scmp.lt.s32.totalorder %s1570_s22, %s1570_s22 }
  0x36   : > { %p1573_p12 = pnand %p1571_p9, %p1531_p13  ;;  %p1580_p7 = por %p1579_p5, %p1578_p3 }
  0x38   : > { %p1574_p0 = pneg %p1573_p12 }
  0x3a   : > { %p1581_p10 = pnand %p1580_p7, %p1574_p0 }
  0x3c   : > { %1584 = shalt.err (!%p1581_p10)
}
  0x3d   : > { %1444 = dma.hbm_to_vmem [thread:$0]  (!%p1770_p11), %s2017_s2, 3968, %s1774_s25, [#allocation8], %s1689_s7, %s1689_s7, %s1690_s8  }
  0x3e   : > { %s1824_s4 = sadd.s32 1, %s1685_s15   ;;  %s27_s23 = sadd.s32 1, %s1681_s14 }
  0x3f   : > { %s24_s5 = ssub.s32 %s1685_s15, %s1824_s4  ;;  %p34_p13 = scmp.ne.s32.totalorder %s1681_s14, %s1677_s13 }
  0x40   : > { %p25_p8 = scmp.eq.s32.totalorder %s24_s5, 0  ;;  %p35_p1 = scmp.eq.s32.totalorder %s1685_s15, 0 }
  0x41   : > { %p2026_p2 = scmp.eq.s32.totalorder %s1742_s16, 3  ;;  %p1455_p6 = scmp.lt.s32.totalorder %s1685_s15, 4 }
  0x42   : > { %s1840_s9 = scalar_select %p25_p8, %s1681_s14, %s27_s23  }
  0x43   : > { %p1834_p4 = por %p2026_p2, %p34_p13  ;;  %p36_p9 = por %p35_p1, %p34_p13 }
  0x44   : > { %s158_s10 = sand.u32 1, %s1681_s14   ;;  %s1247_s25 = sshll.u32 %s1685_s15, 5 }
  0x45   : > { %s1246_s11 = sshll.u32 %s158_s10, 1  ;;  %s1847_s17 = scalar_lea.hbm %s2015_s0, %s1247_s25 }
  0x46   : > { %s162_s21 = scalar_lea.vmem [#allocation4], %s1246_s11  ;;  %p1851_p11 = pnand %p1455_p6, %p36_p9 }
  0x47   : > { %s169_s24 = sshll.u32 %s162_s21, 4  ;;  %s159_s27 = scalar_lea.sflag [#allocation5], %s158_s10  ;;  %s1849_s24 = int_to_ptr.vmem [resolvable:$true] %s169_s24 }
  0x48   : > { %s1585_s28 = scalar_lea.hbm %s1847_s17, 32  ;;  %p1587_p0 = pneg %p1851_p11 }
  0x49   : > { %p1586_p12 = scmp.ne.s32.totalorder %s1847_s17, %s1585_s28  ;;  %s1590_s30 = scalar_lea.hbm %s2015_s0, 128 }
  0x4a   : > { %p1591_p7 = scmp.lt.u32.totalorder %s1847_s17, %s2015_s0  ;;  %p1592_p10 = scmp.lt.u32.totalorder %s1590_s30, %s1585_s28 }
  0x4b   : > { %p1588_p3 = pnand %p1587_p0, %p1586_p12  ;;  %p1594_p8 = scmp.lt.u32.totalorder %s1585_s28, %s1847_s17 }
  0x4c   : > { %p1593_p13 = por %p1592_p10, %p1591_p7 }
  0x4d   : > { %p1589_p5 = pneg %p1588_p3 }
  0x4e   : > { %p1595_p1 = por %p1594_p8, %p1593_p13 }
  0x50   : > { %p1596_p2 = pnand %p1595_p1, %p1589_p5 }
  0x52   : > { %1599 = shalt.err (!%p1596_p2)
}
  0x53   : > { %s1600_s10 = scalar_lea.vmem %s1849_s24, 32  ;;  %s1691_s11 = smov [#allocation4]  }
  0x54   : > { %p1601_p6 = scmp.ne.s32.totalorder %s1849_s24, %s1600_s10  ;;  %s1605_s25 = sshll.u32 %s1691_s11, 4  ;;  %s1606_s25 = int_to_ptr.vmem [resolvable:$false] %s1605_s25 }
  0x55   : > { %s1607_s7 = scalar_lea.vmem %s1606_s25, 64  ;;  %p1608_p3 = scmp.lt.s32.totalorder %s1849_s24, %s1606_s25 }
  0x56   : > { %p1603_p9 = pnand %p1601_p6, %p1587_p0  ;;  %p1609_p7 = scmp.lt.s32.totalorder %s1607_s7, %s1600_s10 }
  0x58   : > { %p1604_p12 = pneg %p1603_p9  ;;  %p1610_p10 = por %p1609_p7, %p1608_p3 }
  0x5a   : > { %p1611_p13 = pnand %p1610_p10, %p1604_p12 }
  0x5c   : > { %1614 = shalt.err (!%p1611_p13)
}
  0x5d   : > { %1448 = dma.hbm_to_vmem [thread:$0]  (!%p1851_p11), %s1847_s17, 32, %s1849_s24, %s159_s27  }
  0x5e   : > { %p2029_p5 = scmp.ne.s32.totalorder %s2024_s20, 0 }
  0x5f   : > { %s1883_s8 = sand.u32 (!%p2029_p5), 1, %s1677_s13   ;;  %p2030_p0 = scmp.ne.s32.totalorder (!%p2029_p5), %s2022_s18, 0 }
  0x60   : > { %178 = sbr.rel (%p2029_p5) target bundleno = 2857 (0xb29), region = 32  ;;  %s1249_s21 = sshll.u32 (!%p2029_p5), %s1883_s8, 1 }
  0x61   : > { %s181_s28 = scalar_lea.sflag (!%p2029_p5), [#allocation5], %s1883_s8  ;;  %s1887_s22 = scalar_lea.vmem (!%p2029_p5), [#allocation4], %s1249_s21 }
  0x67   : > { %1660 = dma.done.wait (%p2030_p0), %s181_s28, 32  }
  0x68   : > { %1662 = vsyncadd (%p2030_p0), %s181_s28, 4294967264  ;;  %p2031_p11 = scmp.eq.s32.totalorder %s1742_s16, 0 }
  0x6a   : > { %1664 = dma.done.wait (%p2031_p11), [#allocation8], 4992   ;;  %p2032_p8 = pmov %p2031_p11 }
  0x6b   : > { %s1252_s20 = sshll.u32 %s1883_s8, 3  ;;  %p2033_p1 = scmp.ne.s32.totalorder %s1742_s16, 0 }
  0x6c   : > { %1666 = vsyncadd (%p2032_p8), [#allocation8], 4294962304  ;;  %s1898_s17 = scalar_lea.vmem [#allocation10], %s1252_s20  ;;  %v221_v0 = vld [vmem:[#allocation7 + $0x10] sm:$0xff] (!%p2033_p1)  ;;  %v219_v1 = vld [vmem:[#allocation7 + $0x20] sm:$0xf] (!%p2033_p1) }
  0x6d   : > { %218 = sbr.rel (%p2033_p1) target bundleno = 230 (0xe6), region = 48  ;;  %s1692_s24 = smov (!%p2033_p1), 96   ;;  %220 = vst [vmem:[#allocation2] sm:$0xf] (!%p2033_p1), %v219_v1  ;;  %v222_v2 = vld [vmem:[#allocation7 + $0x18] sm:$0xff] (!%p2033_p1)  ;;  %vm231_vm0 = vcmask (!%p2033_p1), 7168  }
  0x6e   : > { %225 = vrot.lane.b32.xlu0 (!%p2033_p1), %v221_v0, %s1692_s24 }
  0x72   : > { %227 = vrot.lane.b32.xlu0 (!%p2033_p1), %v222_v2, %s1692_s24 }
  0xe0   : > { %v226_v3 = vpop.permute.xlu0 %225 }
  0xe1   : > { %232 = vst.msk [vmem:[#allocation3] sm:$0xff] %vm231_vm0, %v226_v3 }
  0xe4   : > { %v228_v4 = vpop.permute.xlu0 %227 }
  0xe5   : > { %233 = vst.msk [vmem:[#allocation3 + $0x8] sm:$0xff] %vm231_vm0, %v228_v4 }
  0xe6 PF: > { %v240_v5 = vld [vmem:[#allocation9 + $0x10] sm:$0xff]  ;;  %v241_v6 = vld [vmem:[#allocation9 + $0x18] sm:$0xff]  ;;  %v238_v7 = vld [vmem:[#allocation9] sm:$0xff]  ;;  %v1693_v8 = vmov 0.0|0.0   ;;  %vm1694_vm1 = vmmov 0   ;;  %v1695_v14 = vmov 0.0  }
  0xe7   : > { %1387 = vmatprep.subr.bf16.mxu0 %v1693_v8  ;;  %v1388_v9 = vpack.c.bf16 %v241_v6, %v240_v5  ;;  %1393 = vmatprep.subr.bf16.mxu1 %v1693_v8  ;;  %v239_v10 = vld [vmem:[#allocation9 + $0x8] sm:$0xff]  ;;  %v242_v11 = vld [vmem:[#allocation9 + $0x20] sm:$0xff]  ;;  %v236_v16 = vld [vmem:[%s1887_s22] sm:$0x3]  ;;  %vm319_vm2 = vcmask 130048   ;;  %vm245_vm3 = vcmask 261120  }
  0xe8   : > { %v243_v12 = vld [vmem:[#allocation9 + $0x28] sm:$0xff]  ;;  %v1394_v13 = vpack.c.bf16 %v239_v10, %v238_v7  ;;  %1326 = vmatprep.mubr.msk.f32.mxu1 %vm1694_vm1, %v1695_v14  ;;  %1319 = vmatprep.mubr.msk.f32.mxu0 %vm1694_vm1, %v1695_v14  ;;  %v1256_v20 = vld [vmem:[#allocation9 + $0x30] ss:$0 sm:$0xff]  ;;  %v1257_v25 = vld [vmem:[#allocation9 + $0xe0] ss:$0 sm:$0xff]  ;;  %s1696_s18 = smov 64  }
  0xe9   : > { %1389 = vmatpush3.bf16.msra.mxu0 %v1388_v9  ;;  %v1391_v15 = vpack.c.bf16 %v243_v12, %v242_v11  ;;  %v237_v17 = vld [vmem:[#allocation2] sm:$0x3]  ;;  %s1697_s26 = smov 32   ;;  %v439_v35 = vld [vmem:[#allocation9 + $0x58] sm:$0xff]  ;;  %v440_v36 = vld [vmem:[#allocation9 + $0x60] sm:$0xff]  ;;  %vm431_vm4 = vcmask 523264  }
  0xea   : > { %1390 = vmatprep.subr.bf16.mxu0 %v1693_v8  ;;  %1395 = vmatpush3.bf16.msra.mxu1 %v1394_v13  ;;  %v1258_v27 = vld [vmem:[#allocation9 + $0xe8] ss:$0 sm:$0xff]  ;;  %v435_v37 = vld [vmem:[#allocation9 + $0x38] sm:$0xff]  ;;  %v1397_v38 = vpack.c.bf16 %v440_v36, %v439_v35  ;;  %v436_v39 = vld [vmem:[#allocation9 + $0x40] sm:$0xff]  ;;  %vm738_vm5 = vcmask 1040384   ;;  %vm745_vm6 = vcmask 1046528   ;;  %v701_v35 = vlaneseq }
  0xeb   : > { %1396 = vmatprep.subr.bf16.mxu1 %v1693_v8  ;;  %v441_v40 = vld [vmem:[#allocation9 + $0x68] sm:$0xff]  ;;  %v442_v41 = vld [vmem:[#allocation9 + $0x70] sm:$0xff]  ;;  %v1403_v42 = vpack.c.bf16 %v436_v39, %v435_v37  ;;  %v1261_v56 = vld [vmem:[#allocation9 + $0x78] ss:$0 sm:$0xff]  ;;  %vm861_vm7 = vcmask 7168   ;;  %vm1102_vm8 = vcmask 1041408  }
  0xec   : > { %v437_v43 = vld [vmem:[#allocation9 + $0x48] sm:$0xff]  ;;  %v438_v44 = vld [vmem:[#allocation9 + $0x50] sm:$0xff]  ;;  %v1400_v45 = vpack.c.bf16 %v442_v41, %v441_v40  ;;  %v621_v5 = vld [vmem:[#allocation9 + $0x80] sm:$0xff]  ;;  %vm1121_vm9 = vcmask 64512   ;;  %vm1133_vm10 = vcmask 1043456   ;;  %s1274_s27 = sshll.u32 %s1742_s16, 7 }
  0xed   : > { %1392 = vmatpush3.bf16.msra.mxu0 %v1391_v15  ;;  %1327 = vmatmul.mubr.msk.f32.vlgmr.msra.gmra.mrb[0].mxu1 %vm319_vm2, %v236_v16  ;;  %v1406_v46 = vpack.c.bf16 %v438_v44, %v437_v43  ;;  %v434_v47 = vld [vmem:[#allocation2 + $0x2] sm:$0x3]  ;;  %v623_v7 = vld [vmem:[#allocation9 + $0x90] sm:$0xff]  ;;  %v624_v10 = vld [vmem:[#allocation9 + $0x98] sm:$0xff]  ;;  %v1698_v15 = vmov 0   ;;  %s1152_s29 = sshll.u32 %s1898_s17, 4  ;;  %s1971_s5 = scalar_lea.hbm %s2018_s3, %s1274_s27  ;;  %s1973_s29 = int_to_ptr.vmem [resolvable:$true] %s1152_s29 }
  0xee   : > { %1402 = vmatprep.subr.bf16.mxu0 %v1693_v8  ;;  %1337 = vmatprep.mubr.msk.f32.mxu1 %vm1694_vm1, %v1695_v14  ;;  %v622_v6 = vld [vmem:[#allocation9 + $0x88] sm:$0xff]  ;;  %v1412_v11 = vpack.c.bf16 %v624_v10, %v623_v7  ;;  %v1263_v36 = vld [vmem:[#allocation9 + $0xc0] ss:$0 sm:$0xff]  ;;  %v1264_v37 = vld [vmem:[#allocation9 + $0xc1] ss:$0 sm:$0xff]  ;;  %vm1135_vm11 = vcmask 1045504  }
  0xef   : > { %1398 = vmatpush3.bf16.msra.mxu1 %v1397_v38  ;;  %v1409_v9 = vpack.c.bf16 %v622_v6, %v621_v5  ;;  %v730_v13 = vld [vmem:[#allocation3] sm:$0xff]  ;;  %1504 = vset.pattern.permute.xlu1 %v1698_v15  ;;  %v1265_v43 = vld [vmem:[#allocation9 + $0xc2] ss:$0 sm:$0xff]  ;;  %s1139_s16 = scalar_lea.sflag [#allocation6], %s1883_s8  ;;  %s1615_s10 = scalar_lea.vmem %s1973_s29, 128 }
  0xf0   : > { %1320 = vmatmul.mubr.msk.f32.vlgmr.msra.gmra.mrb[0].mxu0 %vm245_vm3, %v237_v17  ;;  %1399 = vmatprep.subr.bf16.mxu1 %v1693_v8  ;;  %v734_v16 = vrot.slane %v730_v13, 7  ;;  %p1616_p2 = scmp.ne.s32.totalorder %s1973_s29, %s1615_s10  ;;  %s1700_s11 = smov [#allocation10]  }
  0xf1   : > { %1348 = vmatprep.mubr.msk.f32.mxu0 %vm1694_vm1, %v1695_v14  ;;  %1404 = vmatpush3.bf16.msra.mxu0 %v1403_v42  ;;  %v702_v42 = vshrl.u32 %v701_v35, 7  ;;  %s1619_s25 = sshll.u32 %s1700_s11, 4  ;;  %s1620_s25 = int_to_ptr.vmem [resolvable:$false] %s1619_s25 }
  0xf2   : > { %1405 = vmatprep.subr.bf16.mxu0 %v1693_v8  ;;  %1503 = vset.pattern.permute.xlu0 %v1698_v15  ;;  %p1617_p6 = pnand %p1616_p2, %p1834_p4  ;;  %s1621_s7 = scalar_lea.vmem %s1620_s25, 256 }
  0xf3   : > { %1401 = vmatpush3.bf16.msra.mxu1 %v1400_v45  ;;  %p1622_p12 = scmp.lt.s32.totalorder %s1973_s29, %s1620_s25  ;;  %p1623_p3 = scmp.lt.s32.totalorder %s1621_s7, %s1615_s10 }
  0xf4   : > { %1408 = vmatprep.subr.bf16.mxu1 %v1693_v8  ;;  %p1618_p9 = pneg %p1617_p6 }
  0xf5   : > { %1407 = vmatpush3.bf16.msra.mxu0 %v1406_v46  ;;  %p1624_p7 = por %p1623_p3, %p1622_p12 }
  0xf6   : > { %1414 = vmatprep.subr.bf16.mxu0 %v1693_v8  ;;  %1338 = vmatmul.mubr.msk.f32.vlgmr.msra.gmra.mrb[2].mxu1 %vm245_vm3, %v434_v47 }
  0xf7   : > { %1359 = vmatprep.mubr.msk.f32.mxu1 %vm1694_vm1, %v1695_v14  ;;  %1410 = vmatpush3.bf16.msra.mxu1 %v1409_v9  ;;  %p1625_p10 = pnand %p1624_p7, %p1618_p9 }
  0xf8   : > { %1411 = vmatprep.subr.bf16.mxu1 %v1693_v8 }
  0xfb   : > { %1413 = vmatpush3.bf16.msra.mxu1 %v1412_v11  ;;  %v1267_v11 = vld [vmem:[#allocation9 + $0xd0] ss:$0 sm:$0xff] }
  0xfc   : > { %1420 = vmatprep.subr.bf16.mxu1 %v1693_v8 }
 0x1c0   : > { %v389_v18 = vpop.f32.mrb[0].mxu1 }
 0x1c1   : > { %v1328_v19 = vpop.f32.mrb[1].mxu1 }
 0x1c3   : > { %v315_v21 = vpop.f32.mrb[0].mxu0 }
 0x1c4   : > { %v390_v22 = vadd.f32 %v389_v18, %v315_v21  ;;  %v1321_v23 = vpop.f32.mrb[1].mxu0  ;;  %v731_v18 = vld [vmem:[#allocation3 + $0x8] sm:$0xff] }
 0x1c5   : > { %v742_v19 = vrot.slane %v731_v18, 1  ;;  %v735_v21 = vrot.slane %v731_v18, 7 }
 0x1c6   : > { %v397_v24 = vadd.f32 %v1256_v20, %v390_v22 }
 0x1c7   : > { %v747_v23 = vsel %vm745_vm6, %v742_v19, 0.0  ;;  %v1020_v19 = vld [vmem:[#allocation9 + $0xb0] sm:$0xff] }
 0x1c8   : > { %1505 = vtanh.f32 %v397_v24  ;;  %v740_v24 = vsel %vm738_vm5, 0.0, %v735_v21  ;;  %v1021_v21 = vld [vmem:[#allocation9 + $0xb8] sm:$0xff] }
 0x1c9   : > { %v513_v51 = vpop.f32.mrb[2].mxu1 }
 0x1ca   : > { %v1339_v52 = vpop.f32.mrb[3].mxu1 }
 0x1d2   : > { %v1506_v26 = vpop.eup %1505 }
 0x1d3   : > { %v403_v28 = vmul.f32 %v1506_v26, %v1257_v25 }
 0x1d5   : > { %v408_v29 = vadd.f32 %v1258_v27, %v403_v28 }
 0x1d7   : > { %411 = vrot.lane.b32.xlu0 %v408_v29, %s1696_s18  ;;  %v409_v32 = vmul.f32 %v408_v29, %v237_v17  ;;  %v739_v17 = vsel %vm738_vm5, 0.0, %v734_v16 }
 0x249   : > { %v412_v30 = vpop.permute.xlu0 %411 }
 0x24a   : > { %v414_v31 = vmul.f32 %v412_v30, %v408_v29 }
 0x24c   : > { %416 = vrot.lane.b32.xlu0 %v414_v31, %s1697_s26 }
 0x2be   : > { %v417_v33 = vpop.permute.xlu0 %416 }
 0x2bf   : > { %v419_v34 = vadd.f32 %v417_v33, %v409_v32  ;;  %v1699_v33 = vmov 1966171168  }
 0x2c1   : > { %1507 = vtanh.f32 %v419_v34 }
 0x2cb   : > { %v1508_v48 = vpop.eup %1507 }
 0x2cc   : > { %422 = vrot.lane.b32.xlu1 %v1508_v48, %s1696_s18 }
 0x33e   : > { %v423_v49 = vpop.permute.xlu1 %422 }
 0x33f   : > { %v425_v50 = vmul.f32 %v423_v49, %v408_v29 }
 0x341   : > { %427 = vrot.lane.b32.xlu1 %v425_v50, %s1697_s26 }
 0x3b3   : > { %v428_v53 = vpop.permute.xlu1 %427 }
 0x3b4   : > { %v430_v54 = vsel %vm245_vm3, %v428_v53, %v419_v34  ;;  %1349 = vmatmul.mubr.msk.f32.vlgmr.msra.gmra.mrb[2].mxu0 %vm245_vm3, %v428_v53  ;;  %v699_v34 = vunpack.c.l.s4 %v1699_v33 }
 0x3b5   : > { %v1932_v55 = vsel %vm431_vm4, %v430_v54, 0.0  ;;  %1366 = vmatprep.mubr.msk.f32.mxu0 %vm1694_vm1, %v1695_v14 }
 0x3b6   : > { %433 = vst [vmem:[#allocation2] sm:$0x3] %v1932_v55  ;;  %v700_v41 = vunpack.c.0.s8 %v699_v34 }
 0x3b8   : > { %v703_v50 = vsub.s32 %v700_v41, %v702_v42 }
 0x487   : > { %v585_v57 = vpop.f32.mrb[2].mxu0 }
 0x488   : > { %v586_v58 = vadd.f32 %v585_v57, %v513_v51  ;;  %v1350_v59 = vpop.f32.mrb[3].mxu0  ;;  %v722_v57 = vsub.s32 0, %v702_v42 }
 0x489   : > { %v801_v59 = vld [vmem:[#allocation7] sm:$0xff] }
 0x48a   : > { %v593_v60 = vadd.f32 %v1261_v56, %v586_v58 }
 0x48c   : > { %1509 = vtanh.f32 %v593_v60 }
 0x496   : > { %v1510_v61 = vpop.eup %1509 }
 0x497   : > { %v595_v62 = vmul.f32 %v1510_v61, %v1257_v25  ;;  %v741_v25 = vrot.slane %v730_v13, 1 }
 0x499   : > { %v596_v63 = vadd.f32 %v1258_v27, %v595_v62  ;;  %v746_v26 = vsel %vm745_vm6, %v741_v25, 0.0 }
 0x49b   : > { %599 = vrot.lane.b32.xlu0 %v596_v63, %s1696_s18  ;;  %v597_v2 = vmul.f32 %v596_v63, %v434_v47 }
 0x50d   : > { %v600_v0 = vpop.permute.xlu0 %599 }
 0x50e   : > { %v602_v1 = vmul.f32 %v600_v0, %v596_v63 }
 0x510   : > { %604 = vrot.lane.b32.xlu1 %v602_v1, %s1697_s26 }
 0x582   : > { %v605_v3 = vpop.permute.xlu1 %604 }
 0x583   : > { %v607_v4 = vadd.f32 %v605_v3, %v597_v2  ;;  %v1266_v3 = vld [vmem:[#allocation9 + $0xc8] ss:$0 sm:$0xff] }
 0x585   : > { %1511 = vtanh.f32 %v607_v4 }
 0x58f   : > { %v1512_v12 = vpop.eup %1511 }
 0x590   : > { %610 = vrot.lane.b32.xlu0 %v1512_v12, %s1696_s18 }
 0x594   : > { %751 = vperm.xlu0 %1503, %v739_v17   ;;  %v1018_v17 = vld [vmem:[#allocation9 + $0xa0] sm:$0xff] }
 0x598   : > { %771 = vperm.xlu0 %1503, %v731_v18   ;;  %v1019_v18 = vld [vmem:[#allocation9 + $0xa8] sm:$0xff] }
 0x59c   : > { %790 = vperm.xlu0 %1503, %v747_v23  }
 0x602   : > { %v611_v20 = vpop.permute.xlu0 %610 }
 0x603   : > { %v613_v22 = vmul.f32 %v611_v20, %v596_v63  ;;  %v802_v63 = vld [vmem:[#allocation7 + $0x8] sm:$0xff]  ;;  %v1421_v20 = vpack.c.bf16 %v1019_v18, %v1018_v17 }
 0x605   : > { %615 = vrot.lane.b32.xlu1 %v613_v22, %s1697_s26  ;;  %v1424_v22 = vpack.c.bf16 %v1021_v21, %v1020_v19 }
 0x609   : > { %756 = vperm.xlu1 %1504, %v740_v24  }
 0x60d   : > { %767 = vperm.xlu1 %1504, %v730_v13  }
 0x611   : > { %785 = vperm.xlu1 %1504, %v746_v26  }
 0x613   : > { %v752_v31 = vpop.permute.xlu0 %751 }
 0x614   : > { %v763_v39 = vmul.f32 %v1263_v36, %v752_v31 }
 0x617   : > { %v772_v38 = vpop.permute.xlu0 %771 }
 0x618   : > { %v779_v46 = vmul.f32 %v1264_v37, %v772_v38 }
 0x61b   : > { %v791_v47 = vpop.permute.xlu0 %790 }
 0x61c   : > { %v798_v52 = vmul.f32 %v1265_v43, %v791_v47 }
 0x677   : > { %v616_v27 = vpop.permute.xlu1 %615 }
 0x678   : > { %v618_v28 = vsel %vm245_vm3, %v616_v27, %v607_v4  ;;  %1360 = vmatmul.mubr.msk.f32.vlgmr.msra.gmra.mrb[4].mxu1 %vm245_vm3, %v616_v27 }
 0x679   : > { %v1948_v29 = vsel %vm431_vm4, %v618_v28, 0.0  ;;  %1384 = vmatprep.mubr.msk.f32.mxu1 %vm1694_vm1, %v1695_v14  ;;  %1422 = vmatpush3.bf16.msra.mxu1 %v1421_v20 }
 0x67a   : > { %620 = vst [vmem:[#allocation2 + $0x2] sm:$0x3] %v1948_v29  ;;  %1423 = vmatprep.subr.bf16.mxu1 %v1693_v8 }
 0x67d   : > { %1425 = vmatpush3.bf16.msra.mxu1 %v1424_v22 }
 0x688   : > { %v757_v30 = vpop.permute.xlu1 %756 }
 0x689   : > { %v764_v45 = vmul.f32 %v1263_v36, %v757_v30 }
 0x68b   : > { %v781_v51 = vadd.f32 %v779_v46, %v764_v45 }
 0x68c   : > { %v768_v32 = vpop.permute.xlu1 %767 }
 0x68d   : > { %v778_v40 = vmul.f32 %v1264_v37, %v768_v32  ;;  %v800_v60 = vadd.f32 %v798_v52, %v781_v51 }
 0x68f   : > { %v780_v48 = vadd.f32 %v778_v40, %v763_v39  ;;  %v806_v4 = vadd.f32 %v802_v63, %v800_v60  ;;  %v865_v60 = vld [vmem:[#allocation7 + $0x10] sm:$0xff]  ;;  %v868_v63 = vld [vmem:[#allocation7 + $0x38] sm:$0xff] }
 0x690   : > { %v786_v44 = vpop.permute.xlu1 %785 }
 0x691   : > { %v797_v49 = vmul.f32 %v1265_v43, %v786_v44 }
 0x693   : > { %v799_v54 = vadd.f32 %v797_v49, %v780_v48 }
 0x695   : > { %v805_v0 = vadd.f32 %v801_v59, %v799_v54 }
 0x74b   : > { %v693_v53 = vpop.f32.mrb[4].mxu1 }
 0x74c   : > { %v704_v56 = vrot.slane %v693_v53, %v703_v50  ;;  %v1361_v58 = vpop.f32.mrb[5].mxu1 }
 0x74e   : > { %v705_v61 = vcombine.high %v704_v56, %v704_v56  ;;  %v712_v62 = vrot.slane %v704_v56, %v703_v50 }
 0x750   : > { %v719_v1 = vrot.slane %v705_v61, %v703_v50  ;;  %v723_v2 = vrot.slane %v712_v62, %v722_v57  ;;  %v866_v61 = vld [vmem:[#allocation7 + $0x18] sm:$0xff] }
 0x752   : > { %v727_v5 = vrot.slane %v719_v1, %v722_v57  ;;  %v807_v6 = vadd.f32 %v805_v0, %v723_v2  ;;  %v867_v2 = vld [vmem:[#allocation7 + $0x30] sm:$0xff] }
 0x754   : > { %v808_v7 = vadd.f32 %v806_v4, %v727_v5  ;;  %v813_v9 = vadd.f32 %v1266_v3, %v807_v6  ;;  %v864_v5 = vld [vmem:[#allocation7 + $0x28] sm:$0x3] }
 0x756   : > { %v814_v10 = vadd.f32 %v1266_v3, %v808_v7  ;;  %1513 = vtanh.f32 %v813_v9 }
 0x758   : > { %1515 = vtanh.f32 %v814_v10 }
 0x760   : > { %v1514_v12 = vpop.eup %1513 }
 0x761   : > { %v821_v13 = vmul.f32 %v1514_v12, %v1267_v11 }
 0x762   : > { %v1516_v15 = vpop.eup %1515 }
 0x763   : > { %823 = vadd.xlane.f32.xlu1 %v821_v13  ;;  %v822_v16 = vmul.f32 %v1516_v15, %v1267_v11  ;;  %v1271_v13 = vld [vmem:[#allocation9 + $0xd8] ss:$0 sm:$0xff] }
 0x765   : > { %825 = vadd.xlane.f32.xlu0 %v822_v16 }
 0x77b   : > { %1016 = vrot.lane.b32.xlu0 %v693_v53, %s1696_s18 }
 0x7f0   : > { %v824_v23 = vpop.xlane.xlu1 %823 }
 0x7f1   : > { %v827_v24 = vrot.slane %v824_v23, 4 }
 0x7f2   : > { %v826_v25 = vpop.xlane.xlu0 %825 }
 0x7f3   : > { %v828_v26 = vmax.f32 %v824_v23, %v827_v24  ;;  %v833_v27 = vrot.slane %v826_v25, 4 }
 0x7f5   : > { %v829_v28 = vrot.slane %v828_v26, 2  ;;  %v834_v30 = vmax.f32 %v826_v25, %v833_v27  ;;  %v1272_v27 = vld [vmem:[#allocation9 + $0xf0] ss:$0 sm:$0xff] }
 0x7f6   : > { %v1017_v11 = vpop.permute.xlu0 %1016 }
 0x7f7   : > { %v830_v31 = vmax.f32 %v828_v26, %v829_v28  ;;  %v835_v32 = vrot.slane %v834_v30, 2 }
 0x7f9   : > { %v831_v33 = vrot.slane %v830_v31, 1  ;;  %v836_v34 = vmax.f32 %v834_v30, %v835_v32 }
 0x7fb   : > { %v832_v35 = vmax.f32 %v830_v31, %v831_v33  ;;  %v837_v36 = vrot.slane %v836_v34, 1  ;;  %v1124_v31 = vrot.slane %v1932_v55, 6 }
 0x7fd   : > { %v839_v37 = vsub.f32 %v824_v23, %v832_v35  ;;  %v838_v38 = vmax.f32 %v836_v34, %v837_v36  ;;  %v1127_v34 = vrot.slane %v1948_v29, 4 }
 0x7ff   : > { %v841_v39 = vmul.f32 1.442695, %v839_v37  ;;  %v840_v40 = vsub.f32 %v826_v25, %v838_v38 }
 0x801   : > { %1517 = vpow2.f32 %v841_v39  ;;  %v843_v41 = vmul.f32 1.442695, %v840_v40 }
 0x803   : > { %1519 = vpow2.f32 %v843_v41 }
 0x80b   : > { %v1518_v42 = vpop.eup %1517 }
 0x80c   : > { %v845_v43 = vrot.slane %v1518_v42, 4 }
 0x80d   : > { %v1520_v44 = vpop.eup %1519 }
 0x80e   : > { %v846_v45 = vadd.f32 %v1518_v42, %v845_v43  ;;  %v851_v46 = vrot.slane %v1520_v44, 4 }
 0x810   : > { %v852_v47 = vadd.f32 %v1520_v44, %v851_v46  ;;  %v847_v48 = vrot.slane %v846_v45, 2 }
 0x812   : > { %v848_v49 = vadd.f32 %v847_v48, %v846_v45  ;;  %v853_v50 = vrot.slane %v852_v47, 2 }
 0x814   : > { %v849_v51 = vrot.slane %v848_v49, 1  ;;  %v854_v52 = vadd.f32 %v853_v50, %v852_v47 }
 0x816   : > { %v850_v53 = vadd.f32 %v849_v51, %v848_v49  ;;  %v855_v54 = vrot.slane %v854_v52, 1 }
 0x818   : > { %v856_v56 = vadd.f32 %v855_v54, %v854_v52  ;;  %1521 = vrcp.f32 %v850_v53 }
 0x81a   : > { %1523 = vrcp.f32 %v856_v56 }
 0x822   : > { %v1522_v57 = vpop.eup %1521 }
 0x823   : > { %v858_v58 = vmul.f32 %v1522_v57, %v1518_v42 }
 0x824   : > { %v1524_v59 = vpop.eup %1523 }
 0x825   : > { %v860_v62 = vmul.f32 %v1524_v59, %v1520_v44  ;;  %862 = vst.msk [vmem:[#allocation3] sm:$0xff] %vm861_vm7, %v858_v58  ;;  %v869_v0 = vmul.f32 %v865_v60, %v858_v58  ;;  %v944_v6 = vmul.f32 %v867_v2, %v858_v58 }
 0x827   : > { %863 = vst.msk [vmem:[#allocation3 + $0x8] sm:$0xff] %vm861_vm7, %v860_v62  ;;  %v870_v1 = vmul.f32 %v866_v61, %v860_v62  ;;  %v945_v4 = vmul.f32 %v868_v63, %v860_v62 }
 0x829   : > { %v1415_v3 = vpack.c.bf16 %v870_v1, %v869_v0  ;;  %v1418_v7 = vpack.c.bf16 %v945_v4, %v944_v6 }
 0x82b   : > { %1416 = vmatpush3.bf16.msra.mxu0 %v1415_v3 }
 0x82c   : > { %1417 = vmatprep.subr.bf16.mxu0 %v1693_v8 }
 0x82e   : > { %1367 = vmatmul.mubr.msk.f32.vlgmr.msra.gmra.mrb[4].mxu0 %vm319_vm2, %v864_v5 }
 0x82f   : > { %1419 = vmatpush3.bf16.msra.mxu0 %v1418_v7  ;;  %1373 = vmatprep.mubr.msk.f32.mxu0 %vm1694_vm1, %v1695_v14 }
 0x832   : > { %1374 = vmatmul.mubr.msk.f32.vlgmr.msra.gmra.mrb[6].mxu0 %vm319_vm2, %v864_v5 }
 0x901   : > { %v940_v9 = vpop.f32.mrb[4].mxu0 }
 0x902   : > { %v1368_v10 = vpop.f32.mrb[5].mxu0  ;;  %1385 = vmatmul.mubr.msk.f32.vlgmr.msra.gmra.mrb[6].mxu1 %vm245_vm3, %v940_v9 }
 0x905   : > { %v1012_v22 = vpop.f32.mrb[6].mxu0 }
 0x906   : > { %v1375_v23 = vpop.f32.mrb[7].mxu0  ;;  %v1122_v28 = vsel %vm1121_vm9, %v1012_v22, 0.0 }
 0x907   : > { %v1130_v33 = vrot.slane %v1122_v28, 2 }
 0x9d5   : > { %v1091_v12 = vpop.f32.mrb[6].mxu1 }
 0x9d6   : > { %v1095_v15 = vadd.f32 %v1091_v12, %v1017_v11  ;;  %v1386_v16 = vpop.f32.mrb[7].mxu1 }
 0x9d8   : > { %v1101_v8 = vadd.f32 %v1271_v13, %v1095_v15 }
 0x9da   : > { %v1103_v17 = vsel %vm1102_vm8, %v1101_v8, -inf }
 0x9db   : > { %1104 = vmax.xlane.f32.xlu1 %v1103_v17 }
 0xa68   : > { %v1105_v18 = vpop.xlane.xlu1 %1104 }
 0xa69   : > { %v1106_v19 = vsub.f32 %v1101_v8, %v1105_v18 }
 0xa6b   : > { %v1107_v20 = vmul.f32 1.442695, %v1106_v19 }
 0xa6d   : > { %1525 = vpow2.f32 %v1107_v20 }
 0xa77   : > { %v1526_v14 = vpop.eup %1525 }
 0xa78   : > { %v1109_v21 = vsel %vm1102_vm8, %v1526_v14, 0.0 }
 0xa79   : > { %1110 = vadd.xlane.f32.xlu1 %v1109_v21 }
 0xb06   : > { %v1111_v24 = vpop.xlane.xlu1 %1110 }
 0xb07   : > { %1527 = vlog2.f32 %v1111_v24 }
 0xb11   : > { %v1528_v25 = vpop.eup %1527 }
 0xb12   : > { %v1113_v26 = vmul.f32 0.6931472, %v1528_v25 }
 0xb14   : > { %v1114_v30 = vsub.f32 %v1106_v19, %v1113_v26 }
 0xb16   : > { %v1120_v32 = vmul.f32 %v1272_v27, %v1114_v30 }
 0xb18   : > { %v1132_v35 = vsel %vm1102_vm8, %v1120_v32, %v1124_v31 }
 0xb19   : > { %v1134_v36 = vsel %vm1133_vm10, %v1132_v35, %v1127_v34 }
 0xb1a   : > { %v1136_v55 = vsel %vm1135_vm11, %v1134_v36, %v1130_v33 }
 0xb1b   : > { %1137 = vst [vmem:[%s1898_s17] sm:$0xff] %v1136_v55 }
 0xb1c   : > { %1628 = shalt.err (!%p1625_p10)
}
 0xb1d   : > { %s1629_s8 = scalar_lea.hbm %s1971_s5, 128  ;;  %s1633_s22 = scalar_lea.hbm %s2018_s3, 512 }
 0xb1e   : > { %p1630_p13 = scmp.ne.s32.totalorder %s1971_s5, %s1629_s8  ;;  %p1634_p11 = scmp.lt.u32.totalorder %s1971_s5, %s2018_s3 }
 0xb1f   : > { %p1635_p8 = scmp.lt.u32.totalorder %s1633_s22, %s1629_s8  ;;  %p1637_p2 = scmp.lt.u32.totalorder %s1629_s8, %s1971_s5 }
 0xb20   : > { %p1631_p5 = pnand %p1630_p13, %p1834_p4 }
 0xb21   : > { %p1636_p1 = por %p1635_p8, %p1634_p11 }
 0xb22   : > { %p1632_p0 = pneg %p1631_p5 }
 0xb23   : > { %p1638_p6 = por %p1637_p2, %p1636_p1 }
 0xb25   : > { %p1639_p9 = pnand %p1638_p6, %p1632_p0 }
 0xb27   : > { %1642 = shalt.err (!%p1639_p9)
}
 0xb28   : > { %1436 = dma.vmem_to_hbm [thread:$0]  (%p1834_p4), %s1973_s29, 128, %s1971_s5, %s1139_s16  }
 0xb29 PF: > { %p1458_p12 = scmp.ge.s32.totalorder %s1685_s15, 2  ;;  %s1164_s24 = sand.u32 1, %s1673_s12  }
 0xb2a   : > { %p2034_p3 = scmp.ne.s32.totalorder %s2023_s19, 0  ;;  %s1165_s18 = scalar_lea.sflag [#allocation6], %s1164_s24 }
 0xb2c   : > { %p1450_p7 = pnand %p1458_p12, %p2034_p3 }
 0xb2e   : > { %1668 = dma.done.wait (!%p1450_p7), %s1165_s18, 128  }
 0xb2f   : > { %1670 = vsyncadd (!%p1450_p7), %s1165_s18, 4294967168  ;;  %p17_p10 = scmp.ge.s32.totalorder %s1824_s4, 6   ;;  %s2035_s12 = smov %s1677_s13 }
 0xb30   : > { %s2036_s13 = smov %s1681_s14  ;;  %s2037_s14 = smov %s1840_s9 }
 0xb31   : > { %s2038_s15 = smov %s1824_s4  ;;  %19 = sbr.rel (!%p17_p10) target bundleno = 6 (0x6), region = 89 }
 0xb38   :  { %1170 = vsyncpa [#allocation5], 1 }
 0xb39   :  { %1172 = vsyncpa [#allocation5 + $0x1], 1 }
 0xb3a   :  { %1173 = vsyncpa [#allocation8], 1 }
 0xb3b   :  { %1174 = vsyncpa [#allocation6], 1 }
 0xb3c   :  { %1176 = vsyncpa [#allocation6 + $0x1], 1 }

</bundles_post_ra>
